<compile_context>
chip_gen: v6e
topology: v6e:2x2x1
jax: 0.10.0
libtpu: 0.0.40
codegen_flags: <defaults>
</compile_context>

<pallas_src>
import functools

import jax
import jax.numpy as jnp
from jax.experimental import pallas as pl
from jax.experimental.pallas import tpu as pltpu


def _round_up(x, m):
    return ((x + m - 1) // m) * m


# ---------------------------------------------------------------------------
# Kernels
# ---------------------------------------------------------------------------

def _cbr_kernel_resident(p_ref, w_ref, scale_ref, shift_ref, o_ref, *, apply_relu):
    """Whole reduction in one MXU call; fused BN affine + ReLU; single store."""
    acc = jnp.dot(p_ref[...], w_ref[...], preferred_element_type=jnp.float32)
    out = acc * scale_ref[...] + shift_ref[...]
    if apply_relu:
        out = jnp.maximum(out, 0.0)
    o_ref[...] = out.astype(o_ref.dtype)


def _cbr_kernel_ksplit(p_ref, w_ref, scale_ref, shift_ref, o_ref, acc_ref, *, apply_relu):
    """K-tiled reduction: f32 VMEM accumulator, init on k==0, finalize on last k."""
    k = pl.program_id(1)

    @pl.when(k == 0)
    def _():
        acc_ref[...] = jnp.zeros_like(acc_ref)

    acc_ref[...] += jnp.dot(p_ref[...], w_ref[...], preferred_element_type=jnp.float32)

    @pl.when(k == pl.num_programs(1) - 1)
    def _():
        out = acc_ref[...] * scale_ref[...] + shift_ref[...]
        if apply_relu:
            out = jnp.maximum(out, 0.0)
        o_ref[...] = out.astype(o_ref.dtype)


# ---------------------------------------------------------------------------
# Wrapper helpers
# ---------------------------------------------------------------------------

def _extract_patches_nchw(x, ksize, stride, pad, dilation):
    """im2col: x (B, Cin, H, W) -> ((B*Hout*Wout, Cin*kh*kw), Hout, Wout).

    Feature ordering matches PyTorch weight.reshape(Cout, -1):
    channel-major, then kernel row, then kernel col.  Input should already be
    in the compute dtype (bf16) so this single pass writes bf16 directly."""
    B, C, H, W = x.shape
    kh, kw = ksize
    sh, sw = stride
    ph, pw = pad
    dh, dw = dilation
    Hout = (H + 2 * ph - dh * (kh - 1) - 1) // sh + 1
    Wout = (W + 2 * pw - dw * (kw - 1) - 1) // sw + 1
    xp = jnp.pad(x, ((0, 0), (0, 0), (ph, ph), (pw, pw)))
    cols = []
    for i in range(kh):
        for j in range(kw):
            sl = jax.lax.slice(
                xp,
                (0, 0, i * dh, j * dw),
                (B, C, i * dh + sh * (Hout - 1) + 1, j * dw + sw * (Wout - 1) + 1),
                (1, 1, sh, sw),
            )  # (B, C, Hout, Wout)
            cols.append(sl)
    patches = jnp.stack(cols, axis=2)                      # (B, C, kh*kw, Hout, Wout)
    patches = patches.reshape(B, C * kh * kw, Hout, Wout)  # c-major, then (i, j)
    patches = patches.transpose(0, 2, 3, 1)                # (B, Hout, Wout, K)
    return patches.reshape(B * Hout * Wout, C * kh * kw), Hout, Wout


def _vmem_capacity_bytes():
    """Physical per-core VMEM; conservative 64 MiB (v7x-sized) fallback."""
    try:
        cap = getattr(pltpu.get_tpu_info(), "vmem_capacity_bytes", None)
        if cap:
            return int(cap)
    except Exception:
        pass
    return 64 * 1024 * 1024


def _choose_tiling(M, K, Cout_p, tm_req, in_bytes, out_bytes, vmem_cap):
    """Pick (row tile, K tile, number of K steps).

    Prefer keeping the whole (K, Cout_p) weight resident (n_k == 1); tile the
    reduction axis only when the resident working set would bust the per-core
    VMEM budget (mostly relevant on v7x with 64 MiB/TC), keeping tm large."""
    budget = int(vmem_cap * 0.7)
    tm = max(8, min(_round_up(tm_req, 8), _round_up(M, 8)))

    def resident_need(tm_):
        return (K * Cout_p * in_bytes            # weight (ideally single-buffered)
                + 2 * tm_ * K * in_bytes         # double-buffered patch tile
                + 2 * tm_ * Cout_p * out_bytes   # double-buffered output tile
                + 4 * Cout_p * 4)                # scale + shift

    if resident_need(tm) <= budget:
        return tm, K, 1

    # Try K tiling: tk must be a multiple of 128 (block-shape constraint) that
    # divides K exactly (partial reduction blocks would read garbage).
    for tk in sorted((c for c in range(128, K, 128) if K % c == 0), reverse=True):
        need = (2 * tk * Cout_p * in_bytes       # double-buffered weight chunk
                + 2 * tm * tk * in_bytes         # double-buffered patch chunk
                + tm * Cout_p * 4                # f32 accumulator scratch
                + 2 * tm * Cout_p * out_bytes
                + 4 * Cout_p * 4)
        if need <= budget:
            return tm, tk, K // tk

    # TODO(synk): pad K up to a multiple of 128 when no divisor exists and the
    # resident weight is still too large; for now shrink the row tile instead.
    while tm > 64 and resident_need(tm) > budget:
        tm -= 64
    return tm, K, 1


# ---------------------------------------------------------------------------
# Public op
# ---------------------------------------------------------------------------

def conv_bn_relu(
    x, weight, *,
    stride=1, pad=0, dilation=1, groups=1,
    conv_bias=None,
    bn_gamma=None, bn_beta=None, bn_mean=None, bn_var=None, bn_eps=1e-5,
    has_bn=True, has_relu=True,
    tm=512, use_bf16=True, out_dtype=None, out_layout="NCHW",
):
    """ConvBnRelu forward (inference). x: (B, Cin, H, W), weight: (Cout, Cin, kh, kw).

    Returns (B, Cout, Hout, Wout) (or NHWC if out_layout="NHWC").  bf16 matmul
    operands with f32 accumulation — not bit-exact vs a pure-f32 conv."""
    if groups != 1:
        # TODO(synk): grouped convolution (groups > 1) is not implemented in this kernel.
        raise NotImplementedError("groups != 1 not supported")
    if out_layout not in ("NCHW", "NHWC"):
        raise ValueError(f"bad out_layout {out_layout}")

    ksize = (int(weight.shape[2]), int(weight.shape[3]))
    stride = (stride, stride) if isinstance(stride, int) else tuple(stride)
    pad = (pad, pad) if isinstance(pad, int) else tuple(pad)
    dilation = (dilation, dilation) if isinstance(dilation, int) else tuple(dilation)

    B, Cin, H, W = x.shape
    Cout = int(weight.shape[0])
    K = Cin * ksize[0] * ksize[1]
    out_dtype = x.dtype if out_dtype is None else out_dtype

    # Cast activations BEFORE im2col so the inflated patch tensor is produced
    # directly in the bf16 compute dtype (no separate f32->bf16 HBM pass).
    compute_dtype = jnp.bfloat16 if use_bf16 else x.dtype
    x_c = x.astype(compute_dtype)

    if ksize == (1, 1) and pad == (0, 0):
        # 1x1 fast path: no im2col, just an NHWC view (+ subsample for stride>1).
        xs = x_c[:, :, ::stride[0], ::stride[1]]
        Hout, Wout = int(xs.shape[2]), int(xs.shape[3])
        patches = xs.transpose(0, 2, 3, 1).reshape(B * Hout * Wout, Cin)
    else:
        patches, Hout, Wout = _extract_patches_nchw(x_c, ksize, stride, pad, dilation)
    M = B * Hout * Wout

    # Fold BN (eval mode, running stats) and conv bias into a per-channel affine:
    #   y = conv_out * scale + shift
    bias = conv_bias if conv_bias is not None else jnp.zeros((Cout,), jnp.float32)
    if has_bn:
        scale = bn_gamma / jnp.sqrt(bn_var + bn_eps)
        shift = bn_beta - bn_mean * scale + bias * scale
    else:
        scale = jnp.ones((Cout,), jnp.float32)
        shift = bias

    # Lane-dense output stores / fuller MXU columns: pad channels to mult of 128.
    Cout_p = _round_up(Cout, 128)
    scale = jnp.pad(scale.astype(jnp.float32), (0, Cout_p - Cout)).reshape(1, Cout_p)
    shift = jnp.pad(shift.astype(jnp.float32), (0, Cout_p - Cout)).reshape(1, Cout_p)

    w2d = weight.reshape(Cout, K).T.astype(compute_dtype)   # (K, Cout), im2col order
    w2d = jnp.pad(w2d, ((0, 0), (0, Cout_p - Cout)))        # (K, Cout_p)

    in_bytes = jnp.dtype(compute_dtype).itemsize
    out_bytes = jnp.dtype(out_dtype).itemsize
    vmem_cap = _vmem_capacity_bytes()
    tm_eff, tk, n_k = _choose_tiling(M, K, Cout_p, tm, in_bytes, out_bytes, vmem_cap)
    n_m = pl.cdiv(M, tm_eff)

    # Advisory cost estimate for XLA's scheduler around the custom call.
    cost = pl.CostEstimate(
        flops=2 * M * K * Cout_p,
        transcendentals=0,
        bytes_accessed=(M * K * in_bytes + K * Cout_p * in_bytes
                        + M * Cout_p * out_bytes + 2 * Cout_p * 4),
    )

    # VMEM budget: actual working set + headroom, capped below physical capacity
    # so the limit is valid on v7x (64 MiB/TC) as well as v5e/v6e (128 MiB).
    if n_k == 1:
        need = (K * Cout_p * in_bytes + 2 * tm_eff * K * in_bytes
                + 2 * tm_eff * Cout_p * out_bytes + 4 * Cout_p * 4)
    else:
        need = (2 * tk * Cout_p * in_bytes + 2 * tm_eff * tk * in_bytes
                + tm_eff * Cout_p * 4
                + 2 * tm_eff * Cout_p * out_bytes + 4 * Cout_p * 4)
    vmem_limit = max(need + (8 << 20), 32 << 20)
    vmem_limit = min(vmem_limit, int(vmem_cap * 0.9))

    def _run(single_buffer_resident):
        resident_mode = (
            dict(pipeline_mode=pl.Buffered(1)) if single_buffer_resident else {}
        )
        w_mode = resident_mode if n_k == 1 else {}  # weight index changes when K-tiled
        in_specs = [
            pl.BlockSpec((tm_eff, tk), lambda i, k: (i, k)),            # streamed patch tile
            pl.BlockSpec((tk, Cout_p), lambda i, k: (k, 0), **w_mode),  # weight
            pl.BlockSpec((1, Cout_p), lambda i, k: (0, 0), **resident_mode),  # BN scale
            pl.BlockSpec((1, Cout_p), lambda i, k: (0, 0), **resident_mode),  # BN shift
        ]
        if n_k == 1:
            kernel = functools.partial(_cbr_kernel_resident, apply_relu=has_relu)
            scratch = []
        else:
            kernel = functools.partial(_cbr_kernel_ksplit, apply_relu=has_relu)
            scratch = [pltpu.VMEM((tm_eff, Cout_p), jnp.float32)]
        return pl.pallas_call(
            kernel,
            out_shape=jax.ShapeDtypeStruct((M, Cout_p), out_dtype),
            grid_spec=pltpu.PrefetchScalarGridSpec(
                num_scalar_prefetch=0,
                grid=(n_m, n_k),
                in_specs=in_specs,
                out_specs=pl.BlockSpec((tm_eff, Cout_p), lambda i, k: (i, 0)),
                scratch_shapes=scratch,
            ),
            compiler_params=pltpu.CompilerParams(
                dimension_semantics=("parallel", "arbitrary"),
                vmem_limit_bytes=int(vmem_limit),
            ),
            cost_estimate=cost,
        )(patches, w2d, scale, shift)

    try:
        out2d = _run(True)    # single-buffer the grid-constant operands (VMEM win)
    except Exception:
        out2d = _run(False)   # fall back if pipeline_mode=Buffered is unsupported

    out = out2d[:, :Cout].reshape(B, Hout, Wout, Cout)
    if out_layout == "NCHW":
        out = out.transpose(0, 3, 1, 2)
    return out


# ---------------------------------------------------------------------------
# Demo / self-test
# ---------------------------------------------------------------------------

if __name__ == "__main__":
    key = jax.random.PRNGKey(0)

    def _reference(x, weight, stride, pad, gamma, beta, mean, var, eps=1e-5):
        conv = jax.lax.conv_general_dilated(
            x, weight, window_strides=(stride, stride),
            padding=((pad, pad), (pad, pad)),
            rhs_dilation=(1, 1), dimension_numbers=("NCHW", "OIHW", "NCHW"))
        s = gamma / jnp.sqrt(var + eps)
        b = beta - mean * s
        y = conv * s[None, :, None, None] + b[None, :, None, None]
        return jnp.maximum(y, 0.0)

    # --- 3x3 ConvBnRelu: batch=2, 4 -> 8 channels, 16x16, stride 1, pad 1 ---
    B, Cin, Cout, H, W, k = 2, 4, 8, 16, 16, 3
    kx, kw, kg, kb, km, kv = jax.random.split(key, 6)
    x = jax.random.normal(kx, (B, Cin, H, W), jnp.float32)
    fan_in = Cin * k * k
    weight = jax.random.normal(kw, (Cout, Cin, k, k), jnp.float32) * (2.0 / fan_in) ** 0.5
    gamma = 1.0 + 0.1 * jax.random.normal(kg, (Cout,), jnp.float32)
    beta = 0.1 * jax.random.normal(kb, (Cout,), jnp.float32)
    running_mean = 0.1 * jax.random.normal(km, (Cout,), jnp.float32)
    running_var = 1.0 + 0.1 * jax.random.uniform(kv, (Cout,), jnp.float32)

    out = conv_bn_relu(
        x, weight, stride=1, pad=1,
        bn_gamma=gamma, bn_beta=beta, bn_mean=running_mean, bn_var=running_var,
        has_bn=True, has_relu=True, tm=128, use_bf16=True)
    out = jax.block_until_ready(out)
    ref = _reference(x, weight, 1, 1, gamma, beta, running_mean, running_var)
    assert out.shape == (B, Cout, H, W), out.shape
    # bf16 matmul operands (f32 accumulation) -> loosened tolerance vs pure-f32 ref.
    assert jnp.allclose(out, ref, atol=5e-2, rtol=5e-2), float(jnp.max(jnp.abs(out - ref)))

    # --- 1x1 fast path (no im2col): 4 -> 8 channels, stride 1, no pad -------
    kw1, _ = jax.random.split(kw, 2)
    w1 = jax.random.normal(kw1, (Cout, Cin, 1, 1), jnp.float32) * (2.0 / Cin) ** 0.5
    out1 = conv_bn_relu(
        x, w1, stride=1, pad=0,
        bn_gamma=gamma, bn_beta=beta, bn_mean=running_mean, bn_var=running_var,
        has_bn=True, has_relu=True, tm=128, use_bf16=True)
    out1 = jax.block_until_ready(out1)
    ref1 = _reference(x, w1, 1, 0, gamma, beta, running_mean, running_var)
    assert jnp.allclose(out1, ref1, atol=5e-2, rtol=5e-2), float(jnp.max(jnp.abs(out1 - ref1)))

    # --- uneven row count (M % tm != 0): exercises the cdiv grid / masked
    #     trailing block path that replaced the full-tensor pad copy ----------
    x15 = jax.random.normal(kx, (B, Cin, 15, 15), jnp.float32)
    out15 = conv_bn_relu(
        x15, weight, stride=1, pad=1,
        bn_gamma=gamma, bn_beta=beta, bn_mean=running_mean, bn_var=running_var,
        has_bn=True, has_relu=True, tm=128, use_bf16=True)
    out15 = jax.block_until_ready(out15)
    ref15 = _reference(x15, weight, 1, 1, gamma, beta, running_mean, running_var)
    assert out15.shape == (B, Cout, 15, 15), out15.shape
    assert jnp.allclose(out15, ref15, atol=5e-2, rtol=5e-2), float(jnp.max(jnp.abs(out15 - ref15)))

    print("KERNEL_OK")
</pallas_src>

<mosaic_0001>
module attributes {stable_mosaic.version = 11 : i64} {
  func.func @_cbr_kernel_resident(%arg0: i32, %arg1: i32, %arg2: memref<128x36xbf16, #tpu.memory_space<vmem>>, %arg3: memref<36x128xbf16, #tpu.memory_space<vmem>>, %arg4: memref<1x128xf32, #tpu.memory_space<vmem>>, %arg5: memref<1x128xf32, #tpu.memory_space<vmem>>, %arg6: memref<128x128xf32, #tpu.memory_space<vmem>>) attributes {dimension_semantics = [#tpu.dimension_semantics<parallel>, #tpu.dimension_semantics<arbitrary>], iteration_bounds = array<i64: 4, 1>, scalar_prefetch = 0 : i64, scratch_operands = 0 : i64, tpu.core_type = #tpu.core_type<tc>, window_params = [{transform_indices = @transform_0, window_bounds = array<i64: 128, 36>}, {pipeline_mode = #tpu.pipeline_mode<synchronous>, transform_indices = @transform_1, window_bounds = array<i64: 36, 128>}, {pipeline_mode = #tpu.pipeline_mode<synchronous>, transform_indices = @transform_2, window_bounds = array<i64: 1, 128>}, {pipeline_mode = #tpu.pipeline_mode<synchronous>, transform_indices = @transform_3, window_bounds = array<i64: 1, 128>}, {transform_indices = @transform_4, window_bounds = array<i64: 128, 128>}]} {
    %c0 = arith.constant 0 : index
    %c0_0 = arith.constant 0 : index
    %0 = vector.load %arg2[%c0, %c0_0] : memref<128x36xbf16, #tpu.memory_space<vmem>>, vector<128x36xbf16>
    %c0_1 = arith.constant 0 : index
    %c0_2 = arith.constant 0 : index
    %1 = vector.load %arg3[%c0_1, %c0_2] : memref<36x128xbf16, #tpu.memory_space<vmem>>, vector<36x128xbf16>
    %cst = arith.constant dense<0.000000e+00> : vector<128x128xf32>
    %2 = tpu.matmul %0, %1, %cst {dimension_numbers = #tpu.dot_dimension_numbers<[1], [0], [0], [1], [0, 0, 1, 1], [], []>} : vector<128x36xbf16>, vector<36x128xbf16>, vector<128x128xf32> -> vector<128x128xf32>
    %c0_3 = arith.constant 0 : index
    %c0_4 = arith.constant 0 : index
    %3 = vector.load %arg4[%c0_3, %c0_4] : memref<1x128xf32, #tpu.memory_space<vmem>>, vector<1x128xf32>
    %4 = vector.broadcast %3 : vector<1x128xf32> to vector<128x128xf32>
    %5 = arith.mulf %2, %4 : vector<128x128xf32>
    %c0_5 = arith.constant 0 : index
    %c0_6 = arith.constant 0 : index
    %6 = vector.load %arg5[%c0_5, %c0_6] : memref<1x128xf32, #tpu.memory_space<vmem>>, vector<1x128xf32>
    %7 = vector.broadcast %6 : vector<1x128xf32> to vector<128x128xf32>
    %8 = arith.addf %5, %7 : vector<128x128xf32>
    %cst_7 = arith.constant 0.000000e+00 : f32
    %9 = vector.broadcast %cst_7 : f32 to vector<128x128xf32>
    %10 = arith.maximumf %8, %9 : vector<128x128xf32>
    %c0_8 = arith.constant 0 : index
    %c0_9 = arith.constant 0 : index
    %11 = vector.load %arg6[%c0_8, %c0_9] : memref<128x128xf32, #tpu.memory_space<vmem>>, vector<128x128xf32>
    tpu.vector_store %arg6[%c0_8, %c0_9], %10 {strides = array<i32>} : memref<128x128xf32, #tpu.memory_space<vmem>>, vector<128x128xf32>,
    return
  }
  func.func @transform_0(%arg0: i32, %arg1: i32) -> (i32, i32) {
    %c0_i32 = arith.constant 0 : i32
    return %arg0, %arg1 : i32, i32
  }
  func.func @transform_1(%arg0: i32, %arg1: i32) -> (i32, i32) {
    %c0_i32 = arith.constant 0 : i32
    %c0_i32_0 = arith.constant 0 : i32
    return %arg1, %c0_i32 : i32, i32
  }
  func.func @transform_2(%arg0: i32, %arg1: i32) -> (i32, i32) {
    %c0_i32 = arith.constant 0 : i32
    %c0_i32_0 = arith.constant 0 : i32
    %c0_i32_1 = arith.constant 0 : i32
    return %c0_i32, %c0_i32_0 : i32, i32
  }
  func.func @transform_3(%arg0: i32, %arg1: i32) -> (i32, i32) {
    %c0_i32 = arith.constant 0 : i32
    %c0_i32_0 = arith.constant 0 : i32
    %c0_i32_1 = arith.constant 0 : i32
    return %c0_i32, %c0_i32_0 : i32, i32
  }
  func.func @transform_4(%arg0: i32, %arg1: i32) -> (i32, i32) {
    %c0_i32 = arith.constant 0 : i32
    %c0_i32_0 = arith.constant 0 : i32
    return %arg0, %c0_i32 : i32, i32
  }
}

module attributes {stable_mosaic.version = 11 : i64} {
  func.func @_cbr_kernel_resident(%arg0: i32, %arg1: i32, %arg2: memref<128x36xbf16, #tpu.memory_space<vmem>>, %arg3: memref<36x128xbf16, #tpu.memory_space<vmem>>, %arg4: memref<1x128xf32, #tpu.memory_space<vmem>>, %arg5: memref<1x128xf32, #tpu.memory_space<vmem>>, %arg6: memref<128x128xf32, #tpu.memory_space<vmem>>) attributes {dimension_semantics = [#tpu.dimension_semantics<parallel>, #tpu.dimension_semantics<arbitrary>], iteration_bounds = array<i64: 4, 1>, scalar_prefetch = 0 : i64, scratch_operands = 0 : i64, tpu.core_type = #tpu.core_type<tc>, window_params = [{transform_indices = @transform_0, window_bounds = array<i64: 128, 36>}, {transform_indices = @transform_1, window_bounds = array<i64: 36, 128>}, {pipeline_mode = #tpu.pipeline_mode<synchronous>, transform_indices = @transform_2, window_bounds = array<i64: 1, 128>}, {pipeline_mode = #tpu.pipeline_mode<synchronous>, transform_indices = @transform_3, window_bounds = array<i64: 1, 128>}, {transform_indices = @transform_4, window_bounds = array<i64: 128, 128>}]} {
    %c0 = arith.constant 0 : index
    %c0_0 = arith.constant 0 : index
    %0 = vector.load %arg2[%c0, %c0_0] : memref<128x36xbf16, #tpu.memory_space<vmem>>, vector<128x36xbf16>
    %c0_1 = arith.constant 0 : index
    %c0_2 = arith.constant 0 : index
    %1 = vector.load %arg3[%c0_1, %c0_2] : memref<36x128xbf16, #tpu.memory_space<vmem>>, vector<36x128xbf16>
    %cst = arith.constant dense<0.000000e+00> : vector<128x128xf32>
    %2 = tpu.matmul %0, %1, %cst {dimension_numbers = #tpu.dot_dimension_numbers<[1], [0], [0], [1], [0, 0, 1, 1], [], []>} : vector<128x36xbf16>, vector<36x128xbf16>, vector<128x128xf32> -> vector<128x128xf32>
    %c0_3 = arith.constant 0 : index
    %c0_4 = arith.constant 0 : index
    %3 = vector.load %arg4[%c0_3, %c0_4] : memref<1x128xf32, #tpu.memory_space<vmem>>, vector<1x128xf32>
    %4 = vector.broadcast %3 : vector<1x128xf32> to vector<128x128xf32>
    %5 = arith.mulf %2, %4 : vector<128x128xf32>
    %c0_5 = arith.constant 0 : index
    %c0_6 = arith.constant 0 : index
    %6 = vector.load %arg5[%c0_5, %c0_6] : memref<1x128xf32, #tpu.memory_space<vmem>>, vector<1x128xf32>
    %7 = vector.broadcast %6 : vector<1x128xf32> to vector<128x128xf32>
    %8 = arith.addf %5, %7 : vector<128x128xf32>
    %cst_7 = arith.constant 0.000000e+00 : f32
    %9 = vector.broadcast %cst_7 : f32 to vector<128x128xf32>
    %10 = arith.maximumf %8, %9 : vector<128x128xf32>
    %c0_8 = arith.constant 0 : index
    %c0_9 = arith.constant 0 : index
    %11 = vector.load %arg6[%c0_8, %c0_9] : memref<128x128xf32, #tpu.memory_space<vmem>>, vector<128x128xf32>
    tpu.vector_store %arg6[%c0_8, %c0_9], %10 {strides = array<i32>} : memref<128x128xf32, #tpu.memory_space<vmem>>, vector<128x128xf32>,
    return
  }
  func.func @transform_0(%arg0: i32, %arg1: i32) -> (i32, i32) {
    %c0_i32 = arith.constant 0 : i32
    return %arg0, %arg1 : i32, i32
  }
  func.func @transform_1(%arg0: i32, %arg1: i32) -> (i32, i32) {
    %c0_i32 = arith.constant 0 : i32
    %c0_i32_0 = arith.constant 0 : i32
    return %arg1, %c0_i32 : i32, i32
  }
  func.func @transform_2(%arg0: i32, %arg1: i32) -> (i32, i32) {
    %c0_i32 = arith.constant 0 : i32
    %c0_i32_0 = arith.constant 0 : i32
    %c0_i32_1 = arith.constant 0 : i32
    return %c0_i32, %c0_i32_0 : i32, i32
  }
  func.func @transform_3(%arg0: i32, %arg1: i32) -> (i32, i32) {
    %c0_i32 = arith.constant 0 : i32
    %c0_i32_0 = arith.constant 0 : i32
    %c0_i32_1 = arith.constant 0 : i32
    return %c0_i32, %c0_i32_0 : i32, i32
  }
  func.func @transform_4(%arg0: i32, %arg1: i32) -> (i32, i32) {
    %c0_i32 = arith.constant 0 : i32
    %c0_i32_0 = arith.constant 0 : i32
    return %arg0, %c0_i32 : i32, i32
  }
}

</mosaic_0001>

<bundles_post_ra>
// kernel: tpu_custom_call.1
= control target key start
LH: loop header
LB: loop body
LE: loop exit
PB: predicated region body
PF: predicated region fallthrough
CT: control target
= control target key end

     0   :  { %9 = vsyncpa [#allocation3], 0  ;;  %s1073_s0 = inlined_call_operand.vmem [shape: bf16[512,36], index: 0, kind: input, shape index: {}]   ;;  %s1074_s1 = inlined_call_operand.vmem [shape: bf16[36,128], index: 1, kind: input, shape index: {}]   ;;  %s1075_s2 = inlined_call_operand.vmem [shape: f32[1,128], index: 2, kind: input, shape index: {}]   ;;  %s1076_s3 = inlined_call_operand.vmem [shape: f32[1,128], index: 3, kind: input, shape index: {}]   ;;  %s1077_s4 = inlined_call_operand.hbm [shape: f32[512,128], index: 4, kind: output, shape index: {}]  }
   0x1   :  { %11 = vsyncpa [#allocation3 + $0x1], 0  ;;  %s878_s15 = smov 0   ;;  %s880_s16 = smov 0  }
   0x2   :  { %s882_s17 = smov 0   ;;  %s884_s18 = smov 0  }
   0x3   :  { %s886_s19 = smov 0   ;;  %s888_s20 = smov 0  }
   0x4 LB: > { %s627_s21 = sadd.s32 4294967295, %s848_s20   ;;  %s628_s22 = sadd.s32 4294967294, %s848_s20   ;;  %s848_s20 = sphi %s888_s20, %s17_s20   ;;  %s844_s19 = sphi %s886_s19, %s1084_s19   ;;  %s840_s18 = sphi %s884_s18, %s1083_s18   ;;  %s836_s17 = sphi %s882_s17, %s1082_s17   ;;  %s832_s16 = sphi %s880_s16, %s1081_s16   ;;  %s828_s15 = sphi %s878_s15, %s1080_s15  }
   0x5   : > { %s29_s23 = sadd.s32 1, %s844_s19  ;;  %s132_s24 = sadd.s32 1, %s836_s17 }
   0x6   : > { %p31_p0 = scmp.ge.s32.totalorder %s29_s23, 4  ;;  %p142_p1 = scmp.ne.s32.totalorder %s836_s17, %s832_s16 }
   0x7   : > { %p143_p2 = scmp.eq.s32.totalorder %s627_s21, 3  ;;  %p148_p3 = scmp.ne.s32.totalorder %s832_s16, %s828_s15 }
   0x8   : > { %s1086_s23 = smov (%p31_p0, %s29_s23), 0  ;;  %p149_p5 = scmp.eq.s32.totalorder %s628_s22, 3 }
   0x9   : > { %p918_p4 = por %p143_p2, %p142_p1  ;;  %s129_s26 = ssub.s32 %s844_s19, %s1086_s23 }
   0xa   : > { %p632_p6 = scmp.ge.s32.totalorder %s848_s20, 1  ;;  %p130_p7 = scmp.eq.s32.totalorder %s129_s26, 0 }
   0xb   : > { %p925_p8 = por %p149_p5, %p148_p3  ;;  %p194_p9 = scmp.lt.s32.totalorder %s848_s20, 5 }
   0xc   : > { %s931_s28 = scalar_select %p130_p7, %s836_s17, %s132_s24  }
   0xd   : > { %p195_p10 = pnand %p632_p6, %p194_p9 }
   0xe   : > { %s634_s7 = sshll.u32 (!%p195_p10), %s840_s18, 4  ;;  %s225_s14 = sand.u32 (!%p195_p10), 1, %s832_s16  }
   0xf   : > { %198 = sbr.rel (%p195_p10) target bundleno = 260 (0x104), region = 36  ;;  %p229_p11 = scmp.lt.s32.totalorder (!%p195_p10), %s634_s7, 63 }
  0x10   : > { %s633_s29 = sshll.u32 (!%p195_p10), %s225_s14, 7  ;;  %s662_s5 = sshll.u32 (!%p195_p10), %s840_s18, 11 }
  0x11   : > { %s977_s30 = scalar_lea.vmem (!%p195_p10), [#allocation2], %s633_s29  ;;  %s1018_s9 = scalar_lea.hbm (!%p195_p10), %s1077_s4, %s662_s5 }
  0x12   : > { %s539_s6 = sshll.u32 (!%p195_p10), %s977_s30, 4  ;;  %s1028_s18 = scalar_lea.sflag (!%p195_p10), [#allocation3], %s225_s14  ;;  %s1020_s6 = int_to_ptr.vmem [resolvable:$true] %s539_s6 }
  0x13   : > { %s850_s11 = smov (!%p195_p10), [#allocation2]  }
  0x14   : > { %v761_v0 = vld [vmem:[%s1074_s1 + $0x10] ss:$0 sps:$4 sm:$0x33]   ;;  %vm346_vm0 = vcmask 1041408   ;;  %v762_v1 = vld [vmem:[%s1074_s1 + $0x8] sm:$0xff]   ;;  %v763_v3 = vld [vmem:[%s1074_s1] sm:$0xff]  }
  0x15   : > { %702 = vmatprep.subr.msk.bf16.mxu0 %vm346_vm0, %v761_v0  ;;  %703 = vmatprep.subr.msk.bf16.mxu1 %vm346_vm0, %v761_v0  ;;  %v348_v2 = vsel %vm346_vm0, %v761_v0, 0  ;;  %s1088_s7 = smov (!%p229_p11, %s634_s7), 63  ;;  %vm321_vm1 = vcmask 293888   ;;  %v958_v12 = vld [vmem:[%s1075_s2] ss:$0 sm:$0xff]  ;;  %s776_s12 = sshll.u32 %s850_s11, 4  ;;  %s777_s12 = int_to_ptr.vmem [resolvable:$false] %s776_s12 }
  0x16   : > { %675 = vmatpush3.bf16.msra.mxu0 %v348_v2  ;;  %699 = vmatpush3.bf16.msra.mxu1 %v348_v2  ;;  %s635_s10 = sshll.u32 %s1088_s7, 2  ;;  %v963_v14 = vld [vmem:[%s1076_s3] ss:$0 sm:$0xff]  ;;  %p779_p1 = scmp.lt.s32.totalorder %s1020_s6, %s777_s12 }
  0x17   : > { %676 = vmatprep.subr.bf16.mxu0 %v762_v1  ;;  %697 = vmatprep.subr.bf16.mxu1 %v762_v1  ;;  %s235_s13 = scalar_lea.vmem %s1073_s0, %s635_s10  ;;  %s772_s10 = scalar_lea.vmem %s1020_s6, 2048 }
  0x18   : > { %v764_v4 = vld [vmem:[%s235_s13] sm:$0xff]   ;;  %v766_v6 = vld [vmem:[%s235_s13 + $0x8] sm:$0xff]   ;;  %v768_v8 = vld [vmem:[%s235_s13 + $0x10] sm:$0xff]   ;;  %p773_p12 = scmp.ne.s32.totalorder %s1020_s6, %s772_s10 }
  0x19   : > { %v765_v5 = vld [vmem:[%s235_s13 + $0x20] sm:$0xff]   ;;  %680 = vmatprep.mubr.msk.bf16.mxu0 %vm321_vm1, %v764_v4  ;;  %v767_v7 = vld [vmem:[%s235_s13 + $0x28] sm:$0xff]   ;;  %v769_v9 = vld [vmem:[%s235_s13 + $0x30] sm:$0xff]  }
  0x1a   : > { %677 = vmatpush3.bf16.msra.mxu0 %v762_v1  ;;  %700 = vmatpush3.bf16.msra.mxu1 %v762_v1  ;;  %v770_v10 = vld [vmem:[%s235_s13 + $0x18] sm:$0xff]   ;;  %p774_p13 = pnand %p773_p12, %p918_p4 }
  0x1b   : > { %678 = vmatprep.subr.bf16.mxu0 %v763_v3  ;;  %698 = vmatprep.subr.bf16.mxu1 %v763_v3  ;;  %v771_v11 = vld [vmem:[%s235_s13 + $0x38] sm:$0xff]   ;;  %s778_s13 = scalar_lea.vmem %s777_s12, 4096 }
  0x1c   : > { %688 = vmatprep.mubr.msk.bf16.mxu1 %vm321_vm1, %v765_v5  ;;  %p775_p0 = pneg %p774_p13  ;;  %p780_p2 = scmp.lt.s32.totalorder %s778_s13, %s772_s10 }
  0x1e   : > { %679 = vmatpush3.bf16.msra.mxu0 %v763_v3  ;;  %701 = vmatpush3.bf16.msra.mxu1 %v763_v3  ;;  %p781_p3 = por %p780_p2, %p779_p1 }
  0x20   : > { %p782_p5 = pnand %p781_p3, %p775_p0 }
  0x21   : > { %681 = vmatmul.mubr.msk.bf16.vlgmr.msra.gmra.mxu0 %vm321_vm1, %v766_v6  ;;  %689 = vmatmul.mubr.msk.bf16.vlgmr.msra.gmra.mxu1 %vm321_vm1, %v767_v7 }
  0x22   : > { %684 = vmatprep.mubr.msk.bf16.mxu0 %vm321_vm1, %v768_v8  ;;  %692 = vmatprep.mubr.msk.bf16.mxu1 %vm321_vm1, %v769_v9 }
  0x29   : > { %685 = vmatmul.mubr.msk.bf16.gmra.mxu0 %vm321_vm1, %v770_v10  ;;  %693 = vmatmul.mubr.msk.bf16.gmra.mxu1 %vm321_vm1, %v771_v11 }
  0xe1   : > { %v682_v13 = vpop.f32.mrf.mxu0  ;;  %v690_v15 = vpop.f32.mrf.mxu1 }
  0xe2   : > { %v456_v16 = vmul.f32 %v682_v13, %v958_v12  ;;  %v464_v17 = vmul.f32 %v690_v15, %v958_v12 }
  0xe3   : > { %v384_v18 = vpop.f32.mrf.mxu0  ;;  %v416_v19 = vpop.f32.mrf.mxu1 }
  0xe4   : > { %v479_v20 = vadd.f32 %v963_v14, %v456_v16  ;;  %v487_v21 = vadd.f32 %v963_v14, %v464_v17  ;;  %v454_v22 = vmul.f32 %v958_v12, %v384_v18  ;;  %v462_v23 = vmul.f32 %v958_v12, %v416_v19 }
  0xe5   : > { %v683_v24 = vpop.f32.mrf.mxu0  ;;  %v691_v25 = vpop.f32.mrf.mxu1 }
  0xe6   : > { %v495_v26 = vmax.f32 %v479_v20, 0.0  ;;  %v503_v27 = vmax.f32 %v487_v21, 0.0  ;;  %v477_v28 = vadd.f32 %v963_v14, %v454_v22  ;;  %v485_v29 = vadd.f32 %v963_v14, %v462_v23 }
  0xe7   : > { %v457_v30 = vmul.f32 %v683_v24, %v958_v12  ;;  %v465_v31 = vmul.f32 %v691_v25, %v958_v12  ;;  %v387_v32 = vpop.f32.mrf.mxu0  ;;  %v419_v33 = vpop.f32.mrf.mxu1 }
  0xe8   : > { %511 = vst [vmem:[%s977_s30 + $0x10] sm:$0xff] %v495_v26  ;;  %519 = vst [vmem:[%s977_s30 + $0x50] sm:$0xff] %v503_v27  ;;  %v493_v34 = vmax.f32 %v477_v28, 0.0  ;;  %v501_v35 = vmax.f32 %v485_v29, 0.0  ;;  %v455_v36 = vmul.f32 %v958_v12, %v387_v32  ;;  %v463_v37 = vmul.f32 %v958_v12, %v419_v33 }
  0xe9   : > { %v480_v38 = vadd.f32 %v963_v14, %v457_v30  ;;  %v488_v39 = vadd.f32 %v963_v14, %v465_v31  ;;  %v686_v40 = vpop.f32.mrf.mxu0  ;;  %v694_v41 = vpop.f32.mrf.mxu1 }
  0xea   : > { %509 = vst [vmem:[%s977_s30] sm:$0xff] %v493_v34  ;;  %517 = vst [vmem:[%s977_s30 + $0x40] sm:$0xff] %v501_v35  ;;  %v478_v42 = vadd.f32 %v963_v14, %v455_v36  ;;  %v486_v43 = vadd.f32 %v963_v14, %v463_v37  ;;  %v460_v44 = vmul.f32 %v686_v40, %v958_v12 }
  0xeb   : > { %v468_v45 = vmul.f32 %v694_v41, %v958_v12  ;;  %v496_v46 = vmax.f32 %v480_v38, 0.0  ;;  %v504_v47 = vmax.f32 %v488_v39, 0.0  ;;  %v400_v48 = vpop.f32.mrf.mxu0  ;;  %v432_v49 = vpop.f32.mrf.mxu1 }
  0xec   : > { %v494_v50 = vmax.f32 %v478_v42, 0.0  ;;  %v502_v51 = vmax.f32 %v486_v43, 0.0  ;;  %v483_v52 = vadd.f32 %v963_v14, %v460_v44  ;;  %v458_v54 = vmul.f32 %v958_v12, %v400_v48 }
  0xed   : > { %v491_v53 = vadd.f32 %v963_v14, %v468_v45  ;;  %512 = vst [vmem:[%s977_s30 + $0x18] sm:$0xff] %v496_v46  ;;  %520 = vst [vmem:[%s977_s30 + $0x58] sm:$0xff] %v504_v47  ;;  %v466_v55 = vmul.f32 %v958_v12, %v432_v49  ;;  %v687_v56 = vpop.f32.mrf.mxu0  ;;  %v695_v57 = vpop.f32.mrf.mxu1 }
  0xee   : > { %510 = vst [vmem:[%s977_s30 + $0x8] sm:$0xff] %v494_v50  ;;  %518 = vst [vmem:[%s977_s30 + $0x48] sm:$0xff] %v502_v51  ;;  %v499_v58 = vmax.f32 %v483_v52, 0.0  ;;  %v461_v60 = vmul.f32 %v687_v56, %v958_v12  ;;  %v469_v61 = vmul.f32 %v695_v57, %v958_v12  ;;  %v481_v62 = vadd.f32 %v963_v14, %v458_v54 }
  0xef   : > { %v507_v59 = vmax.f32 %v491_v53, 0.0  ;;  %v489_v63 = vadd.f32 %v963_v14, %v466_v55  ;;  %v403_v0 = vpop.f32.mrf.mxu0  ;;  %v435_v1 = vpop.f32.mrf.mxu1 }
  0xf0   : > { %515 = vst [vmem:[%s977_s30 + $0x30] sm:$0xff] %v499_v58  ;;  %v484_v2 = vadd.f32 %v963_v14, %v461_v60  ;;  %v492_v3 = vadd.f32 %v963_v14, %v469_v61  ;;  %v459_v4 = vmul.f32 %v958_v12, %v403_v0  ;;  %v467_v5 = vmul.f32 %v958_v12, %v435_v1 }
  0xf1   : > { %523 = vst [vmem:[%s977_s30 + $0x70] sm:$0xff] %v507_v59  ;;  %v497_v6 = vmax.f32 %v481_v62, 0.0  ;;  %v505_v7 = vmax.f32 %v489_v63, 0.0 }
  0xf2   : > { %v500_v8 = vmax.f32 %v484_v2, 0.0  ;;  %v508_v9 = vmax.f32 %v492_v3, 0.0  ;;  %v482_v10 = vadd.f32 %v963_v14, %v459_v4  ;;  %v490_v11 = vadd.f32 %v963_v14, %v467_v5 }
  0xf3   : > { %513 = vst [vmem:[%s977_s30 + $0x20] sm:$0xff] %v497_v6  ;;  %521 = vst [vmem:[%s977_s30 + $0x60] sm:$0xff] %v505_v7 }
  0xf4   : > { %516 = vst [vmem:[%s977_s30 + $0x38] sm:$0xff] %v500_v8  ;;  %524 = vst [vmem:[%s977_s30 + $0x78] sm:$0xff] %v508_v9  ;;  %v498_v12 = vmax.f32 %v482_v10, 0.0  ;;  %v506_v13 = vmax.f32 %v490_v11, 0.0 }
  0xf6   : > { %514 = vst [vmem:[%s977_s30 + $0x28] sm:$0xff] %v498_v12  ;;  %522 = vst [vmem:[%s977_s30 + $0x68] sm:$0xff] %v506_v13 }
  0xf7   : > { %785 = shalt.err (!%p782_p5)
}
  0xf8   : > { %s786_s14 = scalar_lea.hbm %s1018_s9, 2048  ;;  %s790_s24 = scalar_lea.hbm %s1077_s4, 8192 }
  0xf9   : > { %p787_p6 = scmp.ne.s32.totalorder %s1018_s9, %s786_s14  ;;  %p791_p10 = scmp.lt.s32.totalorder %s1018_s9, %s1077_s4 }
  0xfa   : > { %p792_p11 = scmp.lt.s32.totalorder %s790_s24, %s786_s14 }
  0xfb   : > { %p788_p7 = pnand %p787_p6, %p918_p4 }
  0xfc   : > { %p793_p12 = por %p792_p11, %p791_p10 }
  0xfd   : > { %p789_p9 = pneg %p788_p7 }
  0xff   : > { %p794_p13 = pnand %p793_p12, %p789_p9 }
 0x101   : > { %797 = shalt.err (!%p794_p13)
}
 0x102   : > { %s851_s30 = smov 128   ;;  %s852_s5 = smov 8  }
 0x103   : > { %704 = dma.vmem_to_hbm [thread:$0]  (%p918_p4), %s1020_s6, 2048, %s1018_s9, %s1028_s18, %s851_s30, %s851_s30, %s852_s5  }
 0x104 PF: > { %p710_p0 = scmp.ge.s32.totalorder %s848_s20, 2  ;;  %s554_s7 = sand.u32 1, %s828_s15  }
 0x105   : > { %s555_s8 = scalar_lea.sflag [#allocation3], %s554_s7 }
 0x106   : > { %p707_p1 = pnand %p710_p0, %p925_p8 }
 0x108   : > { %p708_p2 = pneg %p707_p1 }
 0x10a   : > { %823 = dma.done.wait (%p708_p2), %s555_s8, 2048  }
 0x10b   : > { %825 = vsyncadd (%p708_p2), %s555_s8, 4294965248  ;;  %s17_s20 = sadd.s32 1, %s848_s20   ;;  %s1080_s15 = smov %s832_s16 }
 0x10c   : > { %p14_p3 = scmp.ge.s32.totalorder %s17_s20, 6   ;;  %s1081_s16 = smov %s836_s17 }
 0x10d   : > { %s1082_s17 = smov %s931_s28  ;;  %s1083_s18 = smov %s844_s19 }
 0x10e   : > { %s1084_s19 = smov %s1086_s23  ;;  %16 = sbr.rel (!%p14_p3) target bundleno = 4 (0x4), region = 74 }
 0x113   :  { %560 = vsyncpa [#allocation3], 1 }
 0x114   :  { %562 = vsyncpa [#allocation3 + $0x1], 1 }

// kernel: tpu_custom_call.1
= control target key start
LH: loop header
LB: loop body
LE: loop exit
PB: predicated region body
PF: predicated region fallthrough
CT: control target
= control target key end

     0   :  { %9 = vsyncpa [#allocation3], 0  ;;  %s1073_s0 = inlined_call_operand.vmem [shape: bf16[512,36], index: 0, kind: input, shape index: {}]   ;;  %s1074_s1 = inlined_call_operand.vmem [shape: bf16[36,128], index: 1, kind: input, shape index: {}]   ;;  %s1075_s2 = inlined_call_operand.vmem [shape: f32[1,128], index: 2, kind: input, shape index: {}]   ;;  %s1076_s3 = inlined_call_operand.vmem [shape: f32[1,128], index: 3, kind: input, shape index: {}]   ;;  %s1077_s4 = inlined_call_operand.hbm [shape: f32[512,128], index: 4, kind: output, shape index: {}]  }
   0x1   :  { %11 = vsyncpa [#allocation3 + $0x1], 0  ;;  %s878_s15 = smov 0   ;;  %s880_s16 = smov 0  }
   0x2   :  { %s882_s17 = smov 0   ;;  %s884_s18 = smov 0  }
   0x3   :  { %s886_s19 = smov 0   ;;  %s888_s20 = smov 0  }
   0x4 LB: > { %s627_s21 = sadd.s32 4294967295, %s848_s20   ;;  %s628_s22 = sadd.s32 4294967294, %s848_s20   ;;  %s848_s20 = sphi %s888_s20, %s17_s20   ;;  %s844_s19 = sphi %s886_s19, %s1084_s19   ;;  %s840_s18 = sphi %s884_s18, %s1083_s18   ;;  %s836_s17 = sphi %s882_s17, %s1082_s17   ;;  %s832_s16 = sphi %s880_s16, %s1081_s16   ;;  %s828_s15 = sphi %s878_s15, %s1080_s15  }
   0x5   : > { %s29_s23 = sadd.s32 1, %s844_s19  ;;  %s132_s24 = sadd.s32 1, %s836_s17 }
   0x6   : > { %p31_p0 = scmp.ge.s32.totalorder %s29_s23, 4  ;;  %p142_p1 = scmp.ne.s32.totalorder %s836_s17, %s832_s16 }
   0x7   : > { %p143_p2 = scmp.eq.s32.totalorder %s627_s21, 3  ;;  %p148_p3 = scmp.ne.s32.totalorder %s832_s16, %s828_s15 }
   0x8   : > { %s1086_s23 = smov (%p31_p0, %s29_s23), 0  ;;  %p149_p5 = scmp.eq.s32.totalorder %s628_s22, 3 }
   0x9   : > { %p918_p4 = por %p143_p2, %p142_p1  ;;  %s129_s26 = ssub.s32 %s844_s19, %s1086_s23 }
   0xa   : > { %p632_p6 = scmp.ge.s32.totalorder %s848_s20, 1  ;;  %p130_p7 = scmp.eq.s32.totalorder %s129_s26, 0 }
   0xb   : > { %p925_p8 = por %p149_p5, %p148_p3  ;;  %p194_p9 = scmp.lt.s32.totalorder %s848_s20, 5 }
   0xc   : > { %s931_s28 = scalar_select %p130_p7, %s836_s17, %s132_s24  }
   0xd   : > { %p195_p10 = pnand %p632_p6, %p194_p9 }
   0xe   : > { %s634_s7 = sshll.u32 (!%p195_p10), %s840_s18, 4  ;;  %s225_s14 = sand.u32 (!%p195_p10), 1, %s832_s16  }
   0xf   : > { %198 = sbr.rel (%p195_p10) target bundleno = 260 (0x104), region = 36  ;;  %p229_p11 = scmp.lt.s32.totalorder (!%p195_p10), %s634_s7, 63 }
  0x10   : > { %s633_s29 = sshll.u32 (!%p195_p10), %s225_s14, 7  ;;  %s662_s5 = sshll.u32 (!%p195_p10), %s840_s18, 11 }
  0x11   : > { %s977_s30 = scalar_lea.vmem (!%p195_p10), [#allocation2], %s633_s29  ;;  %s1018_s9 = scalar_lea.hbm (!%p195_p10), %s1077_s4, %s662_s5 }
  0x12   : > { %s539_s6 = sshll.u32 (!%p195_p10), %s977_s30, 4  ;;  %s1028_s18 = scalar_lea.sflag (!%p195_p10), [#allocation3], %s225_s14  ;;  %s1020_s6 = int_to_ptr.vmem [resolvable:$true] %s539_s6 }
  0x13   : > { %s850_s11 = smov (!%p195_p10), [#allocation2]  }
  0x14   : > { %v761_v0 = vld [vmem:[%s1074_s1 + $0x10] ss:$0 sps:$4 sm:$0x33]   ;;  %vm346_vm0 = vcmask 1041408   ;;  %v762_v1 = vld [vmem:[%s1074_s1 + $0x8] sm:$0xff]   ;;  %v763_v3 = vld [vmem:[%s1074_s1] sm:$0xff]  }
  0x15   : > { %702 = vmatprep.subr.msk.bf16.mxu0 %vm346_vm0, %v761_v0  ;;  %703 = vmatprep.subr.msk.bf16.mxu1 %vm346_vm0, %v761_v0  ;;  %v348_v2 = vsel %vm346_vm0, %v761_v0, 0  ;;  %s1088_s7 = smov (!%p229_p11, %s634_s7), 63  ;;  %vm321_vm1 = vcmask 293888   ;;  %v958_v12 = vld [vmem:[%s1075_s2] ss:$0 sm:$0xff]  ;;  %s776_s12 = sshll.u32 %s850_s11, 4  ;;  %s777_s12 = int_to_ptr.vmem [resolvable:$false] %s776_s12 }
  0x16   : > { %675 = vmatpush3.bf16.msra.mxu0 %v348_v2  ;;  %699 = vmatpush3.bf16.msra.mxu1 %v348_v2  ;;  %s635_s10 = sshll.u32 %s1088_s7, 2  ;;  %v963_v14 = vld [vmem:[%s1076_s3] ss:$0 sm:$0xff]  ;;  %p779_p1 = scmp.lt.s32.totalorder %s1020_s6, %s777_s12 }
  0x17   : > { %676 = vmatprep.subr.bf16.mxu0 %v762_v1  ;;  %697 = vmatprep.subr.bf16.mxu1 %v762_v1  ;;  %s235_s13 = scalar_lea.vmem %s1073_s0, %s635_s10  ;;  %s772_s10 = scalar_lea.vmem %s1020_s6, 2048 }
  0x18   : > { %v764_v4 = vld [vmem:[%s235_s13] sm:$0xff]   ;;  %v766_v6 = vld [vmem:[%s235_s13 + $0x8] sm:$0xff]   ;;  %v768_v8 = vld [vmem:[%s235_s13 + $0x10] sm:$0xff]   ;;  %p773_p12 = scmp.ne.s32.totalorder %s1020_s6, %s772_s10 }
  0x19   : > { %v765_v5 = vld [vmem:[%s235_s13 + $0x20] sm:$0xff]   ;;  %680 = vmatprep.mubr.msk.bf16.mxu0 %vm321_vm1, %v764_v4  ;;  %v767_v7 = vld [vmem:[%s235_s13 + $0x28] sm:$0xff]   ;;  %v769_v9 = vld [vmem:[%s235_s13 + $0x30] sm:$0xff]  }
  0x1a   : > { %677 = vmatpush3.bf16.msra.mxu0 %v762_v1  ;;  %700 = vmatpush3.bf16.msra.mxu1 %v762_v1  ;;  %v770_v10 = vld [vmem:[%s235_s13 + $0x18] sm:$0xff]   ;;  %p774_p13 = pnand %p773_p12, %p918_p4 }
  0x1b   : > { %678 = vmatprep.subr.bf16.mxu0 %v763_v3  ;;  %698 = vmatprep.subr.bf16.mxu1 %v763_v3  ;;  %v771_v11 = vld [vmem:[%s235_s13 + $0x38] sm:$0xff]   ;;  %s778_s13 = scalar_lea.vmem %s777_s12, 4096 }
  0x1c   : > { %688 = vmatprep.mubr.msk.bf16.mxu1 %vm321_vm1, %v765_v5  ;;  %p775_p0 = pneg %p774_p13  ;;  %p780_p2 = scmp.lt.s32.totalorder %s778_s13, %s772_s10 }
  0x1e   : > { %679 = vmatpush3.bf16.msra.mxu0 %v763_v3  ;;  %701 = vmatpush3.bf16.msra.mxu1 %v763_v3  ;;  %p781_p3 = por %p780_p2, %p779_p1 }
  0x20   : > { %p782_p5 = pnand %p781_p3, %p775_p0 }
  0x21   : > { %681 = vmatmul.mubr.msk.bf16.vlgmr.msra.gmra.mxu0 %vm321_vm1, %v766_v6  ;;  %689 = vmatmul.mubr.msk.bf16.vlgmr.msra.gmra.mxu1 %vm321_vm1, %v767_v7 }
  0x22   : > { %684 = vmatprep.mubr.msk.bf16.mxu0 %vm321_vm1, %v768_v8  ;;  %692 = vmatprep.mubr.msk.bf16.mxu1 %vm321_vm1, %v769_v9 }
  0x29   : > { %685 = vmatmul.mubr.msk.bf16.gmra.mxu0 %vm321_vm1, %v770_v10  ;;  %693 = vmatmul.mubr.msk.bf16.gmra.mxu1 %vm321_vm1, %v771_v11 }
  0xe1   : > { %v682_v13 = vpop.f32.mrf.mxu0  ;;  %v690_v15 = vpop.f32.mrf.mxu1 }
  0xe2   : > { %v456_v16 = vmul.f32 %v682_v13, %v958_v12  ;;  %v464_v17 = vmul.f32 %v690_v15, %v958_v12 }
  0xe3   : > { %v384_v18 = vpop.f32.mrf.mxu0  ;;  %v416_v19 = vpop.f32.mrf.mxu1 }
  0xe4   : > { %v479_v20 = vadd.f32 %v963_v14, %v456_v16  ;;  %v487_v21 = vadd.f32 %v963_v14, %v464_v17  ;;  %v454_v22 = vmul.f32 %v958_v12, %v384_v18  ;;  %v462_v23 = vmul.f32 %v958_v12, %v416_v19 }
  0xe5   : > { %v683_v24 = vpop.f32.mrf.mxu0  ;;  %v691_v25 = vpop.f32.mrf.mxu1 }
  0xe6   : > { %v495_v26 = vmax.f32 %v479_v20, 0.0  ;;  %v503_v27 = vmax.f32 %v487_v21, 0.0  ;;  %v477_v28 = vadd.f32 %v963_v14, %v454_v22  ;;  %v485_v29 = vadd.f32 %v963_v14, %v462_v23 }
  0xe7   : > { %v457_v30 = vmul.f32 %v683_v24, %v958_v12  ;;  %v465_v31 = vmul.f32 %v691_v25, %v958_v12  ;;  %v387_v32 = vpop.f32.mrf.mxu0  ;;  %v419_v33 = vpop.f32.mrf.mxu1 }
  0xe8   : > { %511 = vst [vmem:[%s977_s30 + $0x10] sm:$0xff] %v495_v26  ;;  %519 = vst [vmem:[%s977_s30 + $0x50] sm:$0xff] %v503_v27  ;;  %v493_v34 = vmax.f32 %v477_v28, 0.0  ;;  %v501_v35 = vmax.f32 %v485_v29, 0.0  ;;  %v455_v36 = vmul.f32 %v958_v12, %v387_v32  ;;  %v463_v37 = vmul.f32 %v958_v12, %v419_v33 }
  0xe9   : > { %v480_v38 = vadd.f32 %v963_v14, %v457_v30  ;;  %v488_v39 = vadd.f32 %v963_v14, %v465_v31  ;;  %v686_v40 = vpop.f32.mrf.mxu0  ;;  %v694_v41 = vpop.f32.mrf.mxu1 }
  0xea   : > { %509 = vst [vmem:[%s977_s30] sm:$0xff] %v493_v34  ;;  %517 = vst [vmem:[%s977_s30 + $0x40] sm:$0xff] %v501_v35  ;;  %v478_v42 = vadd.f32 %v963_v14, %v455_v36  ;;  %v486_v43 = vadd.f32 %v963_v14, %v463_v37  ;;  %v460_v44 = vmul.f32 %v686_v40, %v958_v12 }
  0xeb   : > { %v468_v45 = vmul.f32 %v694_v41, %v958_v12  ;;  %v496_v46 = vmax.f32 %v480_v38, 0.0  ;;  %v504_v47 = vmax.f32 %v488_v39, 0.0  ;;  %v400_v48 = vpop.f32.mrf.mxu0  ;;  %v432_v49 = vpop.f32.mrf.mxu1 }
  0xec   : > { %v494_v50 = vmax.f32 %v478_v42, 0.0  ;;  %v502_v51 = vmax.f32 %v486_v43, 0.0  ;;  %v483_v52 = vadd.f32 %v963_v14, %v460_v44  ;;  %v458_v54 = vmul.f32 %v958_v12, %v400_v48 }
  0xed   : > { %v491_v53 = vadd.f32 %v963_v14, %v468_v45  ;;  %512 = vst [vmem:[%s977_s30 + $0x18] sm:$0xff] %v496_v46  ;;  %520 = vst [vmem:[%s977_s30 + $0x58] sm:$0xff] %v504_v47  ;;  %v466_v55 = vmul.f32 %v958_v12, %v432_v49  ;;  %v687_v56 = vpop.f32.mrf.mxu0  ;;  %v695_v57 = vpop.f32.mrf.mxu1 }
  0xee   : > { %510 = vst [vmem:[%s977_s30 + $0x8] sm:$0xff] %v494_v50  ;;  %518 = vst [vmem:[%s977_s30 + $0x48] sm:$0xff] %v502_v51  ;;  %v499_v58 = vmax.f32 %v483_v52, 0.0  ;;  %v461_v60 = vmul.f32 %v687_v56, %v958_v12  ;;  %v469_v61 = vmul.f32 %v695_v57, %v958_v12  ;;  %v481_v62 = vadd.f32 %v963_v14, %v458_v54 }
  0xef   : > { %v507_v59 = vmax.f32 %v491_v53, 0.0  ;;  %v489_v63 = vadd.f32 %v963_v14, %v466_v55  ;;  %v403_v0 = vpop.f32.mrf.mxu0  ;;  %v435_v1 = vpop.f32.mrf.mxu1 }
  0xf0   : > { %515 = vst [vmem:[%s977_s30 + $0x30] sm:$0xff] %v499_v58  ;;  %v484_v2 = vadd.f32 %v963_v14, %v461_v60  ;;  %v492_v3 = vadd.f32 %v963_v14, %v469_v61  ;;  %v459_v4 = vmul.f32 %v958_v12, %v403_v0  ;;  %v467_v5 = vmul.f32 %v958_v12, %v435_v1 }
  0xf1   : > { %523 = vst [vmem:[%s977_s30 + $0x70] sm:$0xff] %v507_v59  ;;  %v497_v6 = vmax.f32 %v481_v62, 0.0  ;;  %v505_v7 = vmax.f32 %v489_v63, 0.0 }
  0xf2   : > { %v500_v8 = vmax.f32 %v484_v2, 0.0  ;;  %v508_v9 = vmax.f32 %v492_v3, 0.0  ;;  %v482_v10 = vadd.f32 %v963_v14, %v459_v4  ;;  %v490_v11 = vadd.f32 %v963_v14, %v467_v5 }
  0xf3   : > { %513 = vst [vmem:[%s977_s30 + $0x20] sm:$0xff] %v497_v6  ;;  %521 = vst [vmem:[%s977_s30 + $0x60] sm:$0xff] %v505_v7 }
  0xf4   : > { %516 = vst [vmem:[%s977_s30 + $0x38] sm:$0xff] %v500_v8  ;;  %524 = vst [vmem:[%s977_s30 + $0x78] sm:$0xff] %v508_v9  ;;  %v498_v12 = vmax.f32 %v482_v10, 0.0  ;;  %v506_v13 = vmax.f32 %v490_v11, 0.0 }
  0xf6   : > { %514 = vst [vmem:[%s977_s30 + $0x28] sm:$0xff] %v498_v12  ;;  %522 = vst [vmem:[%s977_s30 + $0x68] sm:$0xff] %v506_v13 }
  0xf7   : > { %785 = shalt.err (!%p782_p5)
}
  0xf8   : > { %s786_s14 = scalar_lea.hbm %s1018_s9, 2048  ;;  %s790_s24 = scalar_lea.hbm %s1077_s4, 8192 }
  0xf9   : > { %p787_p6 = scmp.ne.s32.totalorder %s1018_s9, %s786_s14  ;;  %p791_p10 = scmp.lt.s32.totalorder %s1018_s9, %s1077_s4 }
  0xfa   : > { %p792_p11 = scmp.lt.s32.totalorder %s790_s24, %s786_s14 }
  0xfb   : > { %p788_p7 = pnand %p787_p6, %p918_p4 }
  0xfc   : > { %p793_p12 = por %p792_p11, %p791_p10 }
  0xfd   : > { %p789_p9 = pneg %p788_p7 }
  0xff   : > { %p794_p13 = pnand %p793_p12, %p789_p9 }
 0x101   : > { %797 = shalt.err (!%p794_p13)
}
 0x102   : > { %s851_s30 = smov 128   ;;  %s852_s5 = smov 8  }
 0x103   : > { %704 = dma.vmem_to_hbm [thread:$0]  (%p918_p4), %s1020_s6, 2048, %s1018_s9, %s1028_s18, %s851_s30, %s851_s30, %s852_s5  }
 0x104 PF: > { %p710_p0 = scmp.ge.s32.totalorder %s848_s20, 2  ;;  %s554_s7 = sand.u32 1, %s828_s15  }
 0x105   : > { %s555_s8 = scalar_lea.sflag [#allocation3], %s554_s7 }
 0x106   : > { %p707_p1 = pnand %p710_p0, %p925_p8 }
 0x108   : > { %p708_p2 = pneg %p707_p1 }
 0x10a   : > { %823 = dma.done.wait (%p708_p2), %s555_s8, 2048  }
 0x10b   : > { %825 = vsyncadd (%p708_p2), %s555_s8, 4294965248  ;;  %s17_s20 = sadd.s32 1, %s848_s20   ;;  %s1080_s15 = smov %s832_s16 }
 0x10c   : > { %p14_p3 = scmp.ge.s32.totalorder %s17_s20, 6   ;;  %s1081_s16 = smov %s836_s17 }
 0x10d   : > { %s1082_s17 = smov %s931_s28  ;;  %s1083_s18 = smov %s844_s19 }
 0x10e   : > { %s1084_s19 = smov %s1086_s23  ;;  %16 = sbr.rel (!%p14_p3) target bundleno = 4 (0x4), region = 74 }
 0x113   :  { %560 = vsyncpa [#allocation3], 1 }
 0x114   :  { %562 = vsyncpa [#allocation3 + $0x1], 1 }

</bundles_post_ra>
